<compile_context>
chip_gen: v5e
topology: v5e:2x2
jax: 0.10.0
libtpu: 0.0.40
codegen_flags: <defaults>
</compile_context>

<pallas_src>
import math

import jax
import jax.numpy as jnp
from jax import lax
from jax.experimental import pallas as pl
from jax.experimental.pallas import tpu as pltpu


def _round_up(x, m):
    return ((x + m - 1) // m) * m


def _choose_tiles(B, N, D, itemsize, tile_b, tile_n, target_bytes=4 << 20):
    """Pick (TB, TN) so a (TB, TN, D) block is ~target_bytes (double-buffered
    it stays well inside scoped VMEM on v5e/v6e/v7x)."""
    if tile_n is not None:
        TN = tile_n
    elif 8 * N * D * itemsize <= target_bytes:
        TN = N
    else:
        TN = max(8, min(N, ((target_bytes // (8 * D * itemsize)) // 8) * 8))
    row_bytes = max(1, TN * D * itemsize)
    if tile_b is not None:
        TB = tile_b
    else:
        TB = (max(1, target_bytes // row_bytes) // 8) * 8
        TB = max(8, min(TB, 1024))
        TB = min(TB, _round_up(B, 8))
    return TB, TN


def _make_genagg_kernel(n_actual, tile_n, need_mask):
    """Build the kernel with static N / tile-N baked in for masking."""

    def kernel(params_ref, x_ref, o_ref, m_ref, s_ref):
        # params_ref : SMEM (3,)  = [p, 1/p, a*log(N) - log(N)/p]
        # x_ref      : VMEM (TB, TN, D)
        # o_ref      : VMEM (TB, D)
        # m_ref/s_ref: VMEM (TB, D) running max / running sum (online LSE)
        k = pl.program_id(1)
        p = params_ref[0]
        inv_p = params_ref[1]
        bias = params_ref[2]

        @pl.when(k == 0)
        def _init():
            m_ref[...] = jnp.full_like(m_ref, -jnp.inf)
            s_ref[...] = jnp.zeros_like(s_ref)

        x = x_ref[...].astype(jnp.float32)            # (TB, TN, D)
        z = p * jnp.log(jnp.abs(x))                   # 1 EUP log / element
        if need_mask:
            n_idx = k * tile_n + lax.broadcasted_iota(jnp.int32, z.shape, 1)
            z = jnp.where(n_idx < n_actual, z, -jnp.inf)

        # Online logsumexp over the N-tile (axis=1).
        c = jnp.max(z, axis=1)                        # (TB, D)
        m_old = m_ref[...]
        m_new = jnp.maximum(m_old, c)
        s_ref[...] = (s_ref[...] * jnp.exp(m_old - m_new)
                      + jnp.sum(jnp.exp(z - m_new[:, None, :]), axis=1))
        m_ref[...] = m_new

        @pl.when(k == pl.num_programs(1) - 1)
        def _finalize():
            lse = m_ref[...] + jnp.log(s_ref[...])    # (TB, D)
            o_ref[...] = jnp.exp(bias + inv_p * lse).astype(o_ref.dtype)

    return kernel


def genagg_forward(x, p_param, a_param,
                   p_domain=(-1.99, 1.99), learnable=True, use_map_fn=True,
                   tile_b=None, tile_n=None):
    """GenAgg.forward for real-valued x of shape (..., N, D); aggregates
    over the -2 axis and returns shape (..., D)."""
    orig_shape = x.shape
    if x.ndim < 2:
        raise ValueError("x must have at least 2 dims (..., N, D)")
    *lead, N, D = orig_shape
    B = 1
    for s in lead:
        B *= int(s)
    x3 = x.reshape(B, N, D)
    itemsize = jnp.dtype(x3.dtype).itemsize

    # ---- scalar glue (cheap, done once in plain JAX) ----------------------
    p = p_param.astype(jnp.float32).reshape(())
    a = a_param.astype(jnp.float32).reshape(())
    if learnable:
        p = jnp.clip(p, p_domain[0], p_domain[1])
    if use_map_fn:
        p = jnp.tan(p * (math.pi / 4.0))              # map_fn from the module
    # TODO(synk): like the module's learnable path, 1/p is inf at p == 0; the
    # p == 0 / +-inf special cases only exist in the non-learnable path.
    inv_p = 1.0 / p
    log_n = jnp.float32(math.log(N))
    bias = a * log_n - inv_p * log_n
    params = jnp.stack([p, inv_p, bias])              # (3,) f32 -> SMEM

    # ---- tiling ------------------------------------------------------------
    TB, TN = _choose_tiles(B, N, D, itemsize, tile_b, tile_n)

    B_pad = _round_up(B, TB)
    N_pad = _round_up(N, TN)
    need_mask = N_pad != N
    if B_pad != B or N_pad != N:
        # Pad with 1.0 (log|1| = 0, finite); padded N entries are masked to
        # -inf inside the kernel, padded B rows are sliced off afterwards.
        x3 = jnp.pad(x3, ((0, B_pad - B), (0, N_pad - N), (0, 0)),
                     constant_values=1)

    grid = (B_pad // TB, N_pad // TN)
    kernel = _make_genagg_kernel(N, TN, need_mask)

    out = pl.pallas_call(
        kernel,
        out_shape=jax.ShapeDtypeStruct((B_pad, D), x3.dtype),
        grid_spec=pltpu.PrefetchScalarGridSpec(
            num_scalar_prefetch=0,
            grid=grid,
            in_specs=[
                pl.BlockSpec(memory_space=pltpu.MemorySpace.SMEM),   # params
                pl.BlockSpec((TB, TN, D), lambda b, k: (b, k, 0)),   # x
            ],
            out_specs=pl.BlockSpec((TB, D), lambda b, k: (b, 0)),
            scratch_shapes=[
                pltpu.VMEM((TB, D), jnp.float32),    # running max
                pltpu.VMEM((TB, D), jnp.float32),    # running sum
            ],
        ),
        compiler_params=pltpu.CompilerParams(
            dimension_semantics=("parallel", "arbitrary")),
    )(params, x3)

    # torch: res.select(dim=agg_dim, index=0) -> (..., D); drop batch padding.
    return out[:B].reshape(*lead, D)


def genagg_reference(x, p_param, a_param):
    """Pure-JAX reference mirroring GenAgg (learnable, shift=False)."""
    p = jnp.clip(p_param.astype(jnp.float32), -1.99, 1.99)
    p = jnp.tan(p * (math.pi / 4.0))
    a = a_param.astype(jnp.float32)
    N = jnp.float32(x.shape[-2])
    z = p * jnp.log(jnp.abs(x.astype(jnp.float32)))
    lse = jax.scipy.special.logsumexp(z, axis=-2, keepdims=True)
    y = jnp.exp(a * jnp.log(N) + (1.0 / p) * (-jnp.log(N) + lse))
    return y[..., 0, :].astype(x.dtype)


if __name__ == "__main__":
    # Deterministic parameters, matching GenAgg.__init__ defaults.
    p_param = jnp.array([1.0], dtype=jnp.float32)
    a_param = jnp.array([0.0], dtype=jnp.float32)

    key = jax.random.PRNGKey(0)

    # Test 1: small input, single N tile.  batch=2, agg axis N=16, D=128.
    x1 = jax.random.normal(key, (2, 16, 128), dtype=jnp.float32)
    y1 = jax.block_until_ready(genagg_forward(x1, p_param, a_param))
    y1_ref = genagg_reference(x1, p_param, a_param)
    assert y1.shape == (2, 128), y1.shape
    assert jnp.allclose(y1, y1_ref, rtol=1e-4, atol=1e-5), \
        float(jnp.max(jnp.abs(y1 - y1_ref)))

    # Test 2: exercise the online-logsumexp N tiling + ragged-N masking path.
    x2 = jax.random.normal(jax.random.PRNGKey(1), (2, 20, 128),
                           dtype=jnp.float32)
    y2 = jax.block_until_ready(
        genagg_forward(x2, p_param, a_param, tile_n=8))
    y2_ref = genagg_reference(x2, p_param, a_param)
    assert y2.shape == (2, 128), y2.shape
    assert jnp.allclose(y2, y2_ref, rtol=1e-4, atol=1e-5), \
        float(jnp.max(jnp.abs(y2 - y2_ref)))

    # Test 3: leading batch dims get flattened (batch=2, channels=4, N=8, D=32).
    x3 = jax.random.normal(jax.random.PRNGKey(2), (2, 4, 8, 32),
                           dtype=jnp.float32)
    y3 = jax.block_until_ready(genagg_forward(x3, p_param, a_param))
    y3_ref = genagg_reference(x3, p_param, a_param)
    assert y3.shape == (2, 4, 32), y3.shape
    assert jnp.allclose(y3, y3_ref, rtol=1e-4, atol=1e-5), \
        float(jnp.max(jnp.abs(y3 - y3_ref)))

    print("KERNEL_OK")
</pallas_src>

<mosaic_0001>
module attributes {stable_mosaic.version = 11 : i64} {
  func.func @kernel(%arg0: i32, %arg1: i32, %arg2: memref<3xf32, #tpu.memory_space<smem>>, %arg3: memref<8x16x128xf32, #tpu.memory_space<vmem>>, %arg4: memref<8x128xf32, #tpu.memory_space<vmem>>, %arg5: memref<8x128xf32, #tpu.memory_space<vmem>>, %arg6: memref<8x128xf32, #tpu.memory_space<vmem>>) attributes {dimension_semantics = [#tpu.dimension_semantics<parallel>, #tpu.dimension_semantics<arbitrary>], iteration_bounds = array<i64: 1, 1>, scalar_prefetch = 0 : i64, scratch_operands = 2 : i64, tpu.core_type = #tpu.core_type<tc>, window_params = [{transform_indices = @transform_0, window_bounds = array<i64: 3>}, {transform_indices = @transform_1, window_bounds = array<i64: 8, 16, 128>}, {transform_indices = @transform_2, window_bounds = array<i64: 8, 128>}]} {
    %c0 = arith.constant 0 : index
    %0 = memref.load %arg2[%c0] : memref<3xf32, #tpu.memory_space<smem>>
    %c1 = arith.constant 1 : index
    %1 = memref.load %arg2[%c1] : memref<3xf32, #tpu.memory_space<smem>>
    %c2 = arith.constant 2 : index
    %2 = memref.load %arg2[%c2] : memref<3xf32, #tpu.memory_space<smem>>
    %c0_i32 = arith.constant 0 : i32
    %3 = arith.cmpi eq, %arg1, %c0_i32 : i32
    %4 = arith.extui %3 : i1 to i32
    %c0_i32_0 = arith.constant 0 : i32
    %5 = arith.cmpi ne, %4, %c0_i32_0 : i32
    scf.if %5 {
      %cst_15 = arith.constant 0xFF800000 : f32
      %29 = vector.broadcast %cst_15 : f32 to vector<8x128xf32>
      %c0_16 = arith.constant 0 : index
      %c0_17 = arith.constant 0 : index
      %30 = vector.load %arg5[%c0_16, %c0_17] : memref<8x128xf32, #tpu.memory_space<vmem>>, vector<8x128xf32>
      tpu.vector_store %arg5[%c0_16, %c0_17], %29 {strides = array<i32>} : memref<8x128xf32, #tpu.memory_space<vmem>>, vector<8x128xf32>,
      %cst_18 = arith.constant 0.000000e+00 : f32
      %31 = vector.broadcast %cst_18 : f32 to vector<8x128xf32>
      %c0_19 = arith.constant 0 : index
      %c0_20 = arith.constant 0 : index
      %32 = vector.load %arg6[%c0_19, %c0_20] : memref<8x128xf32, #tpu.memory_space<vmem>>, vector<8x128xf32>
      tpu.vector_store %arg6[%c0_19, %c0_20], %31 {strides = array<i32>} : memref<8x128xf32, #tpu.memory_space<vmem>>, vector<8x128xf32>,
    } else {
    }
    %c0_1 = arith.constant 0 : index
    %c0_2 = arith.constant 0 : index
    %c0_3 = arith.constant 0 : index
    %6 = vector.load %arg3[%c0_1, %c0_2, %c0_3] : memref<8x16x128xf32, #tpu.memory_space<vmem>>, vector<8x16x128xf32>
    %7 = math.absf %6 : vector<8x16x128xf32>
    %8 = math.log %7 : vector<8x16x128xf32>
    %9 = vector.broadcast %0 : f32 to vector<8x16x128xf32>
    %10 = arith.mulf %9, %8 : vector<8x16x128xf32>
    %cst = arith.constant dense<0xFF800000> : vector<8x128xf32>
    %11 = vector.multi_reduction <maximumf>, %10, %cst [1] : vector<8x16x128xf32> to vector<8x128xf32>
    %c0_4 = arith.constant 0 : index
    %c0_5 = arith.constant 0 : index
    %12 = vector.load %arg5[%c0_4, %c0_5] : memref<8x128xf32, #tpu.memory_space<vmem>>, vector<8x128xf32>
    %13 = arith.maximumf %12, %11 : vector<8x128xf32>
    %c0_6 = arith.constant 0 : index
    %c0_7 = arith.constant 0 : index
    %14 = vector.load %arg6[%c0_6, %c0_7] : memref<8x128xf32, #tpu.memory_space<vmem>>, vector<8x128xf32>
    %15 = arith.subf %12, %13 : vector<8x128xf32>
    %16 = math.exp %15 : vector<8x128xf32>
    %17 = arith.mulf %14, %16 : vector<8x128xf32>
    %18 = vector.shape_cast %13 : vector<8x128xf32> to vector<8x1x128xf32>
    %19 = vector.broadcast %18 : vector<8x1x128xf32> to vector<8x16x128xf32>
    %20 = arith.subf %10, %19 : vector<8x16x128xf32>
    %21 = math.exp %20 : vector<8x16x128xf32>
    %cst_8 = arith.constant dense<0.000000e+00> : vector<8x128xf32>
    %22 = vector.multi_reduction <add>, %21, %cst_8 [1] : vector<8x16x128xf32> to vector<8x128xf32>
    %23 = arith.addf %17, %22 : vector<8x128xf32>
    %c0_9 = arith.constant 0 : index
    %c0_10 = arith.constant 0 : index
    %24 = vector.load %arg6[%c0_9, %c0_10] : memref<8x128xf32, #tpu.memory_space<vmem>>, vector<8x128xf32>
    tpu.vector_store %arg6[%c0_9, %c0_10], %23 {strides = array<i32>} : memref<8x128xf32, #tpu.memory_space<vmem>>, vector<8x128xf32>,
    %c0_11 = arith.constant 0 : index
    %c0_12 = arith.constant 0 : index
    %25 = vector.load %arg5[%c0_11, %c0_12] : memref<8x128xf32, #tpu.memory_space<vmem>>, vector<8x128xf32>
    tpu.vector_store %arg5[%c0_11, %c0_12], %13 {strides = array<i32>} : memref<8x128xf32, #tpu.memory_space<vmem>>, vector<8x128xf32>,
    %c0_i32_13 = arith.constant 0 : i32
    %26 = arith.cmpi eq, %arg1, %c0_i32_13 : i32
    %27 = arith.extui %26 : i1 to i32
    %c0_i32_14 = arith.constant 0 : i32
    %28 = arith.cmpi ne, %27, %c0_i32_14 : i32
    scf.if %28 {
      %c0_15 = arith.constant 0 : index
      %c0_16 = arith.constant 0 : index
      %29 = vector.load %arg5[%c0_15, %c0_16] : memref<8x128xf32, #tpu.memory_space<vmem>>, vector<8x128xf32>
      %c0_17 = arith.constant 0 : index
      %c0_18 = arith.constant 0 : index
      %30 = vector.load %arg6[%c0_17, %c0_18] : memref<8x128xf32, #tpu.memory_space<vmem>>, vector<8x128xf32>
      %31 = math.log %30 : vector<8x128xf32>
      %32 = arith.addf %29, %31 : vector<8x128xf32>
      %33 = vector.broadcast %1 : f32 to vector<8x128xf32>
      %34 = arith.mulf %33, %32 : vector<8x128xf32>
      %35 = vector.broadcast %2 : f32 to vector<8x128xf32>
      %36 = arith.addf %35, %34 : vector<8x128xf32>
      %37 = math.exp %36 : vector<8x128xf32>
      %c0_19 = arith.constant 0 : index
      %c0_20 = arith.constant 0 : index
      %38 = vector.load %arg4[%c0_19, %c0_20] : memref<8x128xf32, #tpu.memory_space<vmem>>, vector<8x128xf32>
      tpu.vector_store %arg4[%c0_19, %c0_20], %37 {strides = array<i32>} : memref<8x128xf32, #tpu.memory_space<vmem>>, vector<8x128xf32>,
    } else {
    }
    return
  }
  func.func @transform_0(%arg0: i32, %arg1: i32) -> i32 {
    %c0_i32 = arith.constant 0 : i32
    %c0_i32_0 = arith.constant 0 : i32
    return %c0_i32 : i32
  }
  func.func @transform_1(%arg0: i32, %arg1: i32) -> (i32, i32, i32) {
    %c0_i32 = arith.constant 0 : i32
    %c0_i32_0 = arith.constant 0 : i32
    return %arg0, %arg1, %c0_i32 : i32, i32, i32
  }
  func.func @transform_2(%arg0: i32, %arg1: i32) -> (i32, i32) {
    %c0_i32 = arith.constant 0 : i32
    %c0_i32_0 = arith.constant 0 : i32
    return %arg0, %c0_i32 : i32, i32
  }
}

</mosaic_0001>

<bundles_post_ra>
// kernel: tpu_custom_call.1
= control target key start
LH: loop header
LB: loop body
LE: loop exit
PB: predicated region body
PF: predicated region fallthrough
CT: control target
= control target key end

     0   :  { %7 = vsyncpa [#allocation7], 0  ;;  %s677_s0 = inlined_call_operand.hbm [shape: f32[3], index: 0, kind: input, shape index: {}]   ;;  %s678_s1 = inlined_call_operand.hbm [shape: f32[8,16,128], index: 1, kind: input, shape index: {}]   ;;  %s679_s2 = inlined_call_operand.hbm [shape: f32[8,128], index: 2, kind: output, shape index: {}]  }
   0x1   :  { %8 = vsyncpa [#allocation5], 0 }
   0x2   :  { %9 = vsyncpa [#allocation6], 0  ;;  %s15_s11 = sshll.u32 %s677_s0, 4  ;;  %s23_s14 = sshll.u32 %s678_s1, 4  ;;  %s16_s11 = int_to_ptr.hbm [resolvable:$true] %s15_s11  ;;  %s24_s14 = int_to_ptr.hbm [resolvable:$true] %s23_s14 }
   0x3   :  { %s540_s15 = smov [#allocation4]   ;;  %s541_s16 = smov [#allocation8]  }
   0x4   :  { %18 = dma.hbm_to_smem %s16_s11, 16, %s540_s15, [#allocation7]  }
   0x5   :  { %s25_s17 = sshll.u32 %s541_s16, 4  ;;  %s542_s18 = smov 128   ;;  %s26_s17 = int_to_ptr.vmem [resolvable:$true] %s25_s17 }
   0x6   :  { %s543_s19 = smov 8  }
   0x7   :  { %31 = dma.hbm_to_vmem [thread:$0]  %s24_s14, 2048, %s26_s17, [#allocation5], %s542_s18, %s542_s18, %s543_s19  }
   0x8   :  { %534 = dma.done.wait [#allocation7], 16  }
   0x9   :  { %535 = vsyncadd [#allocation7], 4294967280 }
   0xa   :  { %536 = dma.done.wait [#allocation5], 2048  }
   0xb   :  { %537 = vsyncadd [#allocation5], 4294965248 }
   0xc   :  { %40 = sfence }
   0xd   :  { %v50_v0 = vld [vmem:[#allocation8] sm:$0xff]  ;;  %v51_v1 = vld [vmem:[#allocation8 + $0x8] sm:$0xff]  ;;  %v52_v2 = vld [vmem:[#allocation8 + $0x10] sm:$0xff]  ;;  %s41_s0 = sld [smem:[#allocation4]]  ;;  %vm196_vm0 = vcmask 1041409   ;;  %vm198_vm1 = vcmask 1042434  }
   0xe   :  { %v53_v3 = vld [vmem:[#allocation8 + $0x18] sm:$0xff]  ;;  %v54_v4 = vld [vmem:[#allocation8 + $0x20] sm:$0xff]  ;;  %v55_v5 = vld [vmem:[#allocation8 + $0x28] sm:$0xff]  ;;  %v66_v6 = vand.u32 2147483647, %v50_v0  ;;  %vm200_vm2 = vcmask 1043459  }
   0xf   :  { %v56_v7 = vld [vmem:[#allocation8 + $0x30] sm:$0xff]  ;;  %v67_v8 = vand.u32 2147483647, %v51_v1  ;;  %v57_v9 = vld [vmem:[#allocation8 + $0x38] sm:$0xff]  ;;  %v68_v10 = vand.u32 2147483647, %v52_v2 }
  0x10   :  { %v69_v11 = vand.u32 2147483647, %v53_v3  ;;  %404 = vlog2.f32 %v66_v6  ;;  %v58_v12 = vld [vmem:[#allocation8 + $0x40] sm:$0xff]  ;;  %v70_v13 = vand.u32 2147483647, %v54_v4  ;;  %v59_v15 = vld [vmem:[#allocation8 + $0x48] sm:$0xff] }
  0x11   :  { %v71_v14 = vand.u32 2147483647, %v55_v5  ;;  %406 = vlog2.f32 %v67_v8  ;;  %v72_v16 = vand.u32 2147483647, %v56_v7  ;;  %v60_v17 = vld [vmem:[#allocation8 + $0x50] sm:$0xff]  ;;  %v61_v19 = vld [vmem:[#allocation8 + $0x58] sm:$0xff] }
  0x12   :  { %408 = vlog2.f32 %v68_v10  ;;  %v73_v18 = vand.u32 2147483647, %v57_v9  ;;  %v74_v20 = vand.u32 2147483647, %v58_v12  ;;  %v62_v21 = vld [vmem:[#allocation8 + $0x60] sm:$0xff]  ;;  %v63_v24 = vld [vmem:[#allocation8 + $0x68] sm:$0xff] }
  0x13   :  { %410 = vlog2.f32 %v69_v11  ;;  %v75_v22 = vand.u32 2147483647, %v59_v15  ;;  %v76_v25 = vand.u32 2147483647, %v60_v17  ;;  %v566_v26 = vstv %s41_s0  ;;  %v64_v28 = vld [vmem:[#allocation8 + $0x70] sm:$0xff]  ;;  %v65_v32 = vld [vmem:[#allocation8 + $0x78] sm:$0xff] }
  0x14   :  { %412 = vlog2.f32 %v70_v13  ;;  %v77_v29 = vand.u32 2147483647, %v61_v19  ;;  %v78_v33 = vand.u32 2147483647, %v62_v21  ;;  %v79_v36 = vand.u32 2147483647, %v63_v24 }
  0x15   :  { %414 = vlog2.f32 %v71_v14  ;;  %v80_v40 = vand.u32 2147483647, %v64_v28  ;;  %v81_v44 = vand.u32 2147483647, %v65_v32  ;;  %vm202_vm3 = vcmask 1044484   ;;  %s397_s1 = sld [smem:[#allocation4 + $0x1]] }
  0x16   :  { %v405_v23 = vpop.eup %404  ;;  %416 = vlog2.f32 %v72_v16  ;;  %vm204_vm4 = vcmask 1045509   ;;  %vm206_vm5 = vcmask 1046534   ;;  %vm208_vm6 = vcmask 1047559   ;;  %s398_s20 = sld [smem:[#allocation4 + $0x2]]  ;;  %s544_s21 = smov [#allocation9]  }
  0x17   :  { %v407_v27 = vpop.eup %406  ;;  %v83_v30 = vmul.f32 0.6931472, %v405_v23  ;;  %418 = vlog2.f32 %v73_v18  ;;  %s384_s22 = sshll.u32 %s544_s21, 4  ;;  %s386_s25 = sshll.u32 %s679_s2, 4  ;;  %s385_s22 = int_to_ptr.vmem [resolvable:$true] %s384_s22  ;;  %s387_s25 = int_to_ptr.hbm [resolvable:$true] %s386_s25 }
  0x18   :  { %v409_v31 = vpop.eup %408  ;;  %v85_v34 = vmul.f32 0.6931472, %v407_v27  ;;  %420 = vlog2.f32 %v74_v20 }
  0x19   :  { %v411_v35 = vpop.eup %410  ;;  %v87_v37 = vmul.f32 0.6931472, %v409_v31  ;;  %422 = vlog2.f32 %v75_v22  ;;  %v569_v38 = vmul.f32 %v566_v26, %v83_v30 }
  0x1a   :  { %v413_v39 = vpop.eup %412  ;;  %v89_v41 = vmul.f32 0.6931472, %v411_v35  ;;  %424 = vlog2.f32 %v76_v25  ;;  %v572_v42 = vmul.f32 %v566_v26, %v85_v34 }
  0x1b   :  { %v415_v43 = vpop.eup %414  ;;  %v91_v45 = vmul.f32 0.6931472, %v413_v39  ;;  %426 = vlog2.f32 %v77_v29  ;;  %v575_v46 = vmul.f32 %v566_v26, %v87_v37 }
  0x1c   :  { %v417_v47 = vpop.eup %416  ;;  %v93_v48 = vmul.f32 0.6931472, %v415_v43  ;;  %428 = vlog2.f32 %v78_v33  ;;  %v578_v49 = vmul.f32 %v566_v26, %v89_v41  ;;  %v131_v50 = vmax.f32 %v569_v38, %v572_v42 }
  0x1d   :  { %v419_v51 = vpop.eup %418  ;;  %v95_v52 = vmul.f32 0.6931472, %v417_v47  ;;  %430 = vlog2.f32 %v79_v36  ;;  %v583_v53 = vmul.f32 %v566_v26, %v91_v45 }
  0x1e   :  { %v421_v54 = vpop.eup %420  ;;  %v97_v55 = vmul.f32 0.6931472, %v419_v51  ;;  %432 = vlog2.f32 %v80_v40  ;;  %v586_v56 = vmul.f32 %v566_v26, %v93_v48  ;;  %v132_v57 = vrot.slane %v131_v50, 4 }
  0x1f   :  { %v423_v58 = vpop.eup %422  ;;  %v99_v59 = vmul.f32 0.6931472, %v421_v54  ;;  %434 = vlog2.f32 %v81_v44  ;;  %v589_v60 = vmul.f32 %v566_v26, %v95_v52  ;;  %v138_v61 = vmax.f32 %v575_v46, %v578_v49 }
  0x20   :  { %v425_v62 = vpop.eup %424  ;;  %v101_v63 = vmul.f32 0.6931472, %v423_v58  ;;  %v594_v0 = vmul.f32 %v566_v26, %v97_v55  ;;  %v133_v1 = vmax.f32 %v131_v50, %v132_v57  ;;  %v145_v2 = vmax.f32 %v583_v53, %v586_v56 }
  0x21   :  { %v427_v3 = vpop.eup %426  ;;  %v103_v4 = vmul.f32 0.6931472, %v425_v62  ;;  %v599_v5 = vmul.f32 %v566_v26, %v99_v59  ;;  %v139_v6 = vrot.slane %v138_v61, 4 }
  0x22   :  { %v429_v7 = vpop.eup %428  ;;  %v105_v8 = vmul.f32 0.6931472, %v427_v3  ;;  %v602_v9 = vmul.f32 %v566_v26, %v101_v63  ;;  %v134_v10 = vrot.slane %v133_v1, 2  ;;  %v146_v11 = vrot.slane %v145_v2, 4 }
  0x23   :  { %v431_v12 = vpop.eup %430  ;;  %v107_v13 = vmul.f32 0.6931472, %v429_v7  ;;  %v605_v14 = vmul.f32 %v566_v26, %v103_v4  ;;  %v140_v15 = vmax.f32 %v138_v61, %v139_v6  ;;  %v152_v16 = vmax.f32 %v589_v60, %v594_v0 }
  0x24   :  { %v433_v17 = vpop.eup %432  ;;  %v109_v18 = vmul.f32 0.6931472, %v431_v12  ;;  %v610_v19 = vmul.f32 %v566_v26, %v105_v8  ;;  %v135_v20 = vmax.f32 %v133_v1, %v134_v10  ;;  %v147_v21 = vmax.f32 %v145_v2, %v146_v11 }
  0x25   :  { %v435_v22 = vpop.eup %434  ;;  %v111_v23 = vmul.f32 0.6931472, %v433_v17  ;;  %v613_v24 = vmul.f32 %v566_v26, %v107_v13  ;;  %v141_v25 = vrot.slane %v140_v15, 2  ;;  %v153_v27 = vrot.slane %v152_v16, 4 }
  0x26   :  { %v113_v28 = vmul.f32 0.6931472, %v435_v22  ;;  %v616_v29 = vmul.f32 %v566_v26, %v109_v18  ;;  %v136_v30 = vrot.slane %v135_v20, 1  ;;  %v148_v31 = vrot.slane %v147_v21, 2 }
  0x27   :  { %v619_v32 = vmul.f32 %v566_v26, %v111_v23  ;;  %v142_v33 = vmax.f32 %v140_v15, %v141_v25  ;;  %v154_v34 = vmax.f32 %v152_v16, %v153_v27  ;;  %v159_v35 = vmax.f32 %v599_v5, %v602_v9 }
  0x28   :  { %v624_v36 = vmul.f32 %v566_v26, %v113_v28  ;;  %v137_v37 = vmax.f32 %v135_v20, %v136_v30  ;;  %v149_v39 = vmax.f32 %v147_v21, %v148_v31  ;;  %v166_v40 = vmax.f32 %v605_v14, %v610_v19 }
  0x29   :  { %v143_v41 = vrot.slane %v142_v33, 1  ;;  %v155_v43 = vrot.slane %v154_v34, 2  ;;  %v160_v44 = vrot.slane %v159_v35, 4  ;;  %v173_v45 = vmax.f32 %v613_v24, %v616_v29 }
  0x2a   :  { %v150_v47 = vrot.slane %v149_v39, 1  ;;  %v167_v48 = vrot.slane %v166_v40, 4  ;;  %v180_v50 = vmax.f32 %v619_v32, %v624_v36 }
  0x2b   :  { %v144_v51 = vmax.f32 %v142_v33, %v143_v41  ;;  %v156_v26 = vmax.f32 %v154_v34, %v155_v43  ;;  %v161_v52 = vmax.f32 %v159_v35, %v160_v44  ;;  %v174_v54 = vrot.slane %v173_v45, 4 }
  0x2c   :  { %v151_v55 = vmax.f32 %v149_v39, %v150_v47  ;;  %v168_v57 = vmax.f32 %v166_v40, %v167_v48  ;;  %v181_v58 = vrot.slane %v180_v50, 4 }
  0x2d   :  { %v157_v59 = vrot.slane %v156_v26, 1  ;;  %v162_v61 = vrot.slane %v161_v52, 2  ;;  %v175_v62 = vmax.f32 %v173_v45, %v174_v54  ;;  %v197_v63 = vsel %vm196_vm0, %v144_v51, %v137_v37 }
  0x2e   :  { %v169_v1 = vrot.slane %v168_v57, 2  ;;  %v182_v2 = vmax.f32 %v180_v50, %v181_v58  ;;  %v199_v7 = vsel %vm198_vm1, %v151_v55, %v197_v63 }
  0x2f   :  { %v158_v3 = vmax.f32 %v156_v26, %v157_v59  ;;  %v163_v4 = vmax.f32 %v161_v52, %v162_v61  ;;  %v176_v6 = vrot.slane %v175_v62, 2 }
  0x30   :  { %v170_v8 = vmax.f32 %v168_v57, %v169_v1  ;;  %v183_v10 = vrot.slane %v182_v2, 2 }
  0x31   :  { %v164_v11 = vrot.slane %v163_v4, 1  ;;  %v177_v12 = vmax.f32 %v175_v62, %v176_v6  ;;  %v201_v16 = vsel %vm200_vm2, %v158_v3, %v199_v7 }
  0x32   :  { %v171_v13 = vrot.slane %v170_v8, 1  ;;  %v184_v15 = vmax.f32 %v182_v2, %v183_v10 }
  0x33   :  { %v165_v17 = vmax.f32 %v163_v4, %v164_v11  ;;  %v178_v18 = vrot.slane %v177_v12, 1 }
  0x34   :  { %v172_v20 = vmax.f32 %v170_v8, %v171_v13  ;;  %v185_v21 = vrot.slane %v184_v15, 1 }
  0x35   :  { %v179_v22 = vmax.f32 %v177_v12, %v178_v18  ;;  %v203_v23 = vsel %vm202_vm3, %v165_v17, %v201_v16 }
  0x36   :  { %v186_v25 = vmax.f32 %v184_v15, %v185_v21  ;;  %v205_v27 = vsel %vm204_vm4, %v172_v20, %v203_v23 }
  0x37   :  { %v207_v28 = vsel %vm206_vm5, %v179_v22, %v205_v27 }
  0x38   :  { %v639_v30 = vsel %vm208_vm6, %v186_v25, %v207_v28 }
  0x39   :  { %v218_v31 = vrot.slane %v639_v30, 1  ;;  %v219_v33 = vrot.slane %v639_v30, 2  ;;  %v220_v34 = vrot.slane %v639_v30, 3  ;;  %v221_v35 = vrot.slane %v639_v30, 4 }
  0x3a   :  { %v225_v37 = vperm.slane %v639_v30, 0  ;;  %v222_v41 = vrot.slane %v639_v30, 5  ;;  %v223_v50 = vrot.slane %v639_v30, 6  ;;  %v224_v52 = vrot.slane %v639_v30, 7 }
  0x3b   :  { %v226_v39 = vperm.slane %v218_v31, 0  ;;  %v227_v40 = vperm.slane %v219_v33, 0  ;;  %v228_v43 = vperm.slane %v220_v34, 0  ;;  %v229_v51 = vperm.slane %v221_v35, 0 }
  0x3c   :  { %v241_v44 = vsub.f32 %v569_v38, %v225_v37  ;;  %v242_v45 = vsub.f32 %v572_v42, %v225_v37  ;;  %v230_v55 = vperm.slane %v222_v41, 0  ;;  %v231_v61 = vperm.slane %v223_v50, 0 }
  0x3d   :  { %v243_v47 = vsub.f32 %v575_v46, %v226_v39  ;;  %v244_v48 = vsub.f32 %v578_v49, %v226_v39  ;;  %v245_v26 = vsub.f32 %v583_v53, %v227_v40  ;;  %v246_v54 = vsub.f32 %v586_v56, %v227_v40 }
  0x3e   :  { %v247_v57 = vsub.f32 %v589_v60, %v228_v43  ;;  %v257_v58 = vmul.f32 1.442695, %v241_v44  ;;  %v259_v38 = vmul.f32 1.442695, %v242_v45  ;;  %v248_v42 = vsub.f32 %v594_v0, %v228_v43 }
  0x3f   :  { %v261_v59 = vmul.f32 1.442695, %v243_v47  ;;  %v263_v46 = vmul.f32 1.442695, %v244_v48  ;;  %v249_v49 = vsub.f32 %v599_v5, %v229_v51  ;;  %v265_v62 = vmul.f32 1.442695, %v245_v26 }
  0x40   :  { %436 = vpow2.f32 %v257_v58  ;;  %v250_v53 = vsub.f32 %v602_v9, %v229_v51  ;;  %v267_v63 = vmul.f32 1.442695, %v246_v54  ;;  %v232_v1 = vperm.slane %v224_v52, 0 }
  0x41   :  { %438 = vpow2.f32 %v259_v38  ;;  %v251_v56 = vsub.f32 %v605_v14, %v230_v55  ;;  %v269_v60 = vmul.f32 1.442695, %v247_v57  ;;  %v252_v2 = vsub.f32 %v610_v19, %v230_v55 }
  0x42   :  { %440 = vpow2.f32 %v261_v59  ;;  %v271_v0 = vmul.f32 1.442695, %v248_v42  ;;  %v253_v3 = vsub.f32 %v613_v24, %v231_v61  ;;  %v273_v4 = vmul.f32 1.442695, %v249_v49 }
  0x43   :  { %442 = vpow2.f32 %v263_v46  ;;  %v254_v5 = vsub.f32 %v616_v29, %v231_v61  ;;  %v275_v6 = vmul.f32 1.442695, %v250_v53  ;;  %v255_v7 = vsub.f32 %v619_v32, %v232_v1 }
  0x44   :  { %444 = vpow2.f32 %v265_v62  ;;  %v277_v8 = vmul.f32 1.442695, %v251_v56  ;;  %v256_v10 = vsub.f32 %v624_v36, %v232_v1  ;;  %v279_v19 = vmul.f32 1.442695, %v252_v2 }
  0x45   :  { %446 = vpow2.f32 %v267_v63  ;;  %v281_v12 = vmul.f32 1.442695, %v253_v3  ;;  %v283_v15 = vmul.f32 1.442695, %v254_v5  ;;  %v285_v16 = vmul.f32 1.442695, %v255_v7 }
  0x46   :  { %v437_v9 = vpop.eup %436  ;;  %448 = vpow2.f32 %v269_v60  ;;  %v287_v20 = vmul.f32 1.442695, %v256_v10  ;;  %v213_v35 = vsub.f32 -inf, %v639_v30 }
  0x47   :  { %v439_v14 = vpop.eup %438  ;;  %450 = vpow2.f32 %v271_v0 }
  0x48   :  { %v441_v11 = vpop.eup %440  ;;  %452 = vpow2.f32 %v273_v4  ;;  %v289_v24 = vadd.f32 %v439_v14, %v437_v9  ;;  %v214_v55 = vmul.f32 1.442695, %v213_v35 }
  0x49   :  { %v443_v13 = vpop.eup %442  ;;  %454 = vpow2.f32 %v275_v6 }
  0x4a   :  { %v445_v29 = vpop.eup %444  ;;  %456 = vpow2.f32 %v277_v8  ;;  %v290_v17 = vrot.slane %v289_v24, 4  ;;  %v296_v18 = vadd.f32 %v443_v13, %v441_v11 }
  0x4b   :  { %v447_v32 = vpop.eup %446  ;;  %458 = vpow2.f32 %v279_v19 }
  0x4c   :  { %v449_v21 = vpop.eup %448  ;;  %460 = vpow2.f32 %v281_v12  ;;  %v291_v36 = vadd.f32 %v290_v17, %v289_v24  ;;  %v297_v22 = vrot.slane %v296_v18, 4  ;;  %v303_v23 = vadd.f32 %v447_v32, %v445_v29 }
  0x4d   :  { %v451_v25 = vpop.eup %450  ;;  %462 = vpow2.f32 %v283_v15 }
  0x4e   :  { %v453_v27 = vpop.eup %452  ;;  %464 = vpow2.f32 %v285_v16  ;;  %v292_v28 = vrot.slane %v291_v36, 2  ;;  %v298_v31 = vadd.f32 %v297_v22, %v296_v18  ;;  %v304_v33 = vrot.slane %v303_v23, 4 }
  0x4f   :  { %v455_v34 = vpop.eup %454  ;;  %466 = vpow2.f32 %v287_v20  ;;  %v310_v37 = vadd.f32 %v451_v25, %v449_v21 }
  0x50   :  { %v457_v39 = vpop.eup %456  ;;  %v293_v40 = vadd.f32 %v292_v28, %v291_v36  ;;  %v299_v41 = vrot.slane %v298_v31, 2  ;;  %v305_v43 = vadd.f32 %v304_v33, %v303_v23  ;;  %v317_v44 = vadd.f32 %v455_v34, %v453_v27 }
  0x51   :  { %v459_v45 = vpop.eup %458  ;;  %v311_v47 = vrot.slane %v310_v37, 4  ;;  %468 = vpow2.f32 %v214_v55 }
  0x52   :  { %v461_v48 = vpop.eup %460  ;;  %v294_v50 = vrot.slane %v293_v40, 1  ;;  %v300_v51 = vadd.f32 %v299_v41, %v298_v31  ;;  %v306_v26 = vrot.slane %v305_v43, 2  ;;  %v318_v52 = vrot.slane %v317_v44, 4 }
  0x53   :  { %v463_v54 = vpop.eup %462  ;;  %v312_v57 = vadd.f32 %v311_v47, %v310_v37  ;;  %v324_v58 = vadd.f32 %v459_v45, %v457_v39  ;;  %v372_v41 = vstv %s397_s1 }
  0x54   :  { %v465_v38 = vpop.eup %464  ;;  %v295_v42 = vadd.f32 %v294_v50, %v293_v40  ;;  %v301_v59 = vrot.slane %v300_v51, 1  ;;  %v307_v46 = vadd.f32 %v306_v26, %v305_v43  ;;  %v319_v61 = vadd.f32 %v318_v52, %v317_v44 }
  0x55   :  { %v467_v49 = vpop.eup %466  ;;  %v313_v62 = vrot.slane %v312_v57, 2  ;;  %v325_v53 = vrot.slane %v324_v58, 4  ;;  %v331_v63 = vadd.f32 %v463_v54, %v461_v48  ;;  %v374_v44 = vstv %s398_s20 }
  0x56   :  { %v302_v1 = vadd.f32 %v301_v59, %v300_v51  ;;  %v308_v56 = vrot.slane %v307_v46, 1  ;;  %v320_v60 = vrot.slane %v319_v61, 2  ;;  %v338_v2 = vadd.f32 %v467_v49, %v465_v38 }
  0x57   :  { %v314_v0 = vadd.f32 %v313_v62, %v312_v57  ;;  %v326_v3 = vadd.f32 %v325_v53, %v324_v58  ;;  %v332_v4 = vrot.slane %v331_v63, 4  ;;  %v469_v17 = vpop.eup %468 }
  0x58   :  { %v309_v5 = vadd.f32 %v308_v56, %v307_v46  ;;  %v321_v6 = vadd.f32 %v320_v60, %v319_v61  ;;  %v339_v9 = vrot.slane %v338_v2, 4  ;;  %v353_v7 = vsel %vm196_vm0, %v302_v1, %v295_v42 }
  0x59   :  { %v315_v8 = vrot.slane %v314_v0, 1  ;;  %v327_v14 = vrot.slane %v326_v3, 2  ;;  %v333_v10 = vadd.f32 %v332_v4, %v331_v63  ;;  %v216_v27 = vmul.f32 0.0, %v469_v17 }
  0x5a   :  { %v322_v19 = vrot.slane %v321_v6, 1  ;;  %v340_v11 = vadd.f32 %v339_v9, %v338_v2  ;;  %v354_v12 = vsel %vm198_vm1, %v309_v5, %v353_v7 }
  0x5b   :  { %v316_v24 = vadd.f32 %v315_v8, %v314_v0  ;;  %v328_v13 = vadd.f32 %v327_v14, %v326_v3  ;;  %v334_v15 = vrot.slane %v333_v10, 2 }
  0x5c   :  { %v323_v29 = vadd.f32 %v322_v19, %v321_v6  ;;  %v341_v16 = vrot.slane %v340_v11, 2 }
  0x5d   :  { %v329_v18 = vrot.slane %v328_v13, 1  ;;  %v335_v32 = vadd.f32 %v334_v15, %v333_v10  ;;  %v355_v20 = vsel %vm200_vm2, %v316_v24, %v354_v12 }
  0x5e   :  { %v342_v21 = vadd.f32 %v341_v16, %v340_v11  ;;  %v356_v36 = vsel %vm202_vm3, %v323_v29, %v355_v20 }
  0x5f   :  { %v330_v22 = vadd.f32 %v329_v18, %v328_v13  ;;  %v336_v23 = vrot.slane %v335_v32, 1 }
  0x60   :  { %v343_v25 = vrot.slane %v342_v21, 1 }
  0x61   :  { %v337_v28 = vadd.f32 %v336_v23, %v335_v32  ;;  %v357_v31 = vsel %vm204_vm4, %v330_v22, %v356_v36 }
  0x62   :  { %v344_v33 = vadd.f32 %v343_v25, %v342_v21 }
  0x63   :  { %v358_v34 = vsel %vm206_vm5, %v337_v28, %v357_v31 }
  0x64   :  { %v359_v35 = vsel %vm208_vm6, %v344_v33, %v358_v34 }
  0x65   :  { %v361_v37 = vadd.f32 %v359_v35, %v216_v27 }
  0x67   :  { %470 = vlog2.f32 %v361_v37 }
  0x6d   :  { %v471_v39 = vpop.eup %470 }
  0x6e   :  { %v370_v40 = vmul.f32 0.6931472, %v471_v39 }
  0x70   :  { %v371_v43 = vadd.f32 %v370_v40, %v639_v30 }
  0x72   :  { %v373_v45 = vmul.f32 %v372_v41, %v371_v43 }
  0x74   :  { %v375_v47 = vadd.f32 %v374_v44, %v373_v45 }
  0x76   :  { %v376_v48 = vmul.f32 1.442695, %v375_v47 }
  0x78   :  { %472 = vpow2.f32 %v376_v48 }
  0x7e   :  { %v473_v50 = vpop.eup %472 }
  0x7f   :  { %378 = vst [vmem:[#allocation9] sm:$0xff] %v473_v50 }
  0x80   :  { %389 = dma.vmem_to_hbm [thread:$0]  %s385_s22, 128, %s387_s25, [#allocation6]  }
  0x81   :  { %538 = dma.done.wait [#allocation6], 128  }
  0x82   :  { %539 = vsyncadd [#allocation6], 4294967168 }
  0x83   :  { %394 = vsyncpa [#allocation5], 1 }
  0x84   :  { %395 = vsyncpa [#allocation6], 1 }
  0x85   :  { %396 = vsyncpa [#allocation7], 1 }

</bundles_post_ra>
